<compile_context>
chip_gen: v7x
topology: tpu7x:2x2x1
jax: 0.10.0
libtpu: 0.0.40
codegen_flags: <defaults>
</compile_context>

<pallas_src>
import math

import jax
import jax.numpy as jnp
from jax.experimental import pallas as pl
from jax.experimental.pallas import tpu as pltpu


_PALLAS_MIN_BYTES = 256 * 1024          # below this, let XLA fuse jnp.max
_SEQ_TILE_TARGET = 512                  # folded-seq rows per block target
_MAX_FOLDED_LANES = 1024                # cap on k*H after lane densification
_HARD_CAP_BYTES = 12 * 1024 * 1024      # relaxed per-buffer cap (fallback path)
_VMEM_LIMIT_BYTES = 32 * 1024 * 1024


def _dtype_min_value(dtype):
    dtype = jnp.dtype(dtype)
    if jnp.issubdtype(dtype, jnp.floating):
        return float("-inf")
    return int(jnp.iinfo(dtype).min)


def _round_up(x, m):
    return (x + m - 1) // m * m


def _budget_and_depth():
    """Generation-aware per-input-buffer block budget and pipeline depth."""
    try:
        vmem_bytes = int(pltpu.get_tpu_info().vmem_capacity_bytes)
    except Exception:
        vmem_bytes = 128 << 20
    if vmem_bytes <= (64 << 20):
        # v7x: 64 MiB physical VMEM, ~3.2 TB/s HBM -> bigger blocks, 2-deep.
        return 8 << 20, 2
    # v5e / v6e: 128 MiB VMEM; slower HBM already amortizes per-step overhead.
    return 4 << 20, 3


def _pick_fold_factor(S, H):
    """Fold k consecutive sequence rows into the lane dim.

    (B, S, H) -> (B, S//k, k*H) is a free row-major reshape, so k must divide
    S exactly -- no wrapper-side padding (extra HBM traffic) is ever needed.
    Prefer the smallest k that makes k*H a multiple of 128 (lane-dense vregs).
    """
    if S <= 1 or H % 128 == 0:
        return 1
    k_dense = 128 // math.gcd(H, 128)            # lcm(H,128)//H
    if k_dense * H <= _MAX_FOLDED_LANES and S % k_dense == 0:
        return k_dense
    # Best-effort partial densification: largest k <= 128//H dividing S.
    if H < 128:
        for k in range(min(128 // H, S), 1, -1):
            if S % k == 0:
                return k
    return 1


def _choose_tiling(B, s_folded, kh, itemsize, budget):
    """Pick (batch_tile, seq_tile, sublane_pack).

    Keeps the (tb, ts, kh) input block under `budget` VMEM bytes (accounting
    for lane/sublane padding) whenever a pack-aligned batch divisor exists;
    otherwise uses a relaxed full-batch block under _HARD_CAP_BYTES.  Returns
    (None, None, pack) only for pathological shapes with no legal tiling.
    """
    pack = max(8, 32 // itemsize)                # f32: 8, bf16: 16, int8: 32
    kh_vmem = _round_up(kh, 128)                 # lane padding in VMEM
    row_bytes = kh_vmem * itemsize

    def legal_ts(t):
        if t >= s_folded:
            return s_folded                      # full dim is always legal
        return max(pack, t // pack * pack)       # else multiple of pack

    def vmem_rows(t):
        return _round_up(t, pack)                # sublane padding in VMEM

    def pick_tb(t):
        tile_bytes = vmem_rows(t) * row_bytes
        tb_target = budget // tile_bytes if tile_bytes else 0
        if tb_target >= B:
            return B
        for d in range(min(tb_target, B), 0, -1):
            if B % d == 0 and d % pack == 0:
                return d
        return None

    ts = legal_ts(min(s_folded, _SEQ_TILE_TARGET))
    tb = pick_tb(ts)
    while tb is None and ts > pack:
        ts = legal_ts(ts // 2)
        tb = pick_tb(ts)

    if tb is None:
        # No pack-aligned divisor of B fits (e.g. odd batch): accept a
        # full-batch block under a relaxed cap, double-buffered.
        ts = legal_ts(max(1, _HARD_CAP_BYTES // (B * row_bytes)))
        if B * vmem_rows(ts) * row_bytes <= _HARD_CAP_BYTES:
            tb = B
        else:
            return None, None, pack
    return tb, ts, pack


def _make_kernel(fill, valid_last, mask_last):
    """Streaming max-reduce over the (folded) sequence axis.

    Grid: (split, batch_block, seq_block).  The output block index ignores
    the seq axis, so o_ref is a VMEM-resident accumulator across it.  Only
    the single, globally-last sequence tile is masked (ragged S); the few
    extra VPU ops are free filler under the HBM DMA bound.
    """
    def kernel(x_ref, o_ref):
        s = pl.program_id(2)

        @pl.when(s == 0)
        def _init():
            o_ref[...] = jnp.full(o_ref.shape, fill, o_ref.dtype)

        if mask_last:
            is_last = jnp.logical_and(
                pl.program_id(0) == pl.num_programs(0) - 1,
                s == pl.num_programs(2) - 1)

            @pl.when(is_last)
            def _masked():
                row = jax.lax.broadcasted_iota(jnp.int32, x_ref.shape, 1)
                xm = jnp.where(row < valid_last, x_ref[...], fill)
                o_ref[...] = jnp.maximum(o_ref[...], jnp.max(xm, axis=1))

            @pl.when(jnp.logical_not(is_last))
            def _full():
                o_ref[...] = jnp.maximum(o_ref[...],
                                         jnp.max(x_ref[...], axis=1))
        else:
            o_ref[...] = jnp.maximum(o_ref[...], jnp.max(x_ref[...], axis=1))

    return kernel


def _lambda_maxpool_pallas(x):
    B, S, H = x.shape
    dtype = x.dtype
    itemsize = jnp.dtype(dtype).itemsize
    fill = _dtype_min_value(dtype)

    budget, depth = _budget_and_depth()

    # ---- lane densification: free reshape only, never a pad -----------------
    k = _pick_fold_factor(S, H)
    kh = k * H
    s_folded = S // k
    xf = x.reshape(B, s_folded, kh)

    # ---- tiling under the per-buffer VMEM budget -----------------------------
    tb, ts, pack = _choose_tiling(B, s_folded, kh, itemsize, budget)
    if tb is None:
        # TODO(synk): pathological batch/hidden sizes with no legal VMEM
        # tiling; let XLA handle the reduce.
        return jnp.max(x, axis=1)

    kh_vmem = _round_up(kh, 128)
    block_bytes = tb * _round_up(ts, pack) * kh_vmem * itemsize
    if block_bytes > budget:
        depth = 2   # relaxed-cap fallback block: keep total buffering modest

    grid_b = B // tb
    grid_s_total = pl.cdiv(s_folded, ts)

    # ---- 2-way sequence split when the batch axis collapses to one block ----
    n_split = 1
    if grid_b == 1 and grid_s_total >= 2 and grid_s_total % 2 == 0:
        n_split = 2
    grid_s = grid_s_total // n_split

    # ---- in-kernel masking of the (single, globally-last) ragged tile -------
    rem = s_folded % ts
    mask_last = rem != 0
    valid_last = rem if mask_last else ts

    total_steps = n_split * grid_b * grid_s
    in_spec_kwargs = {}
    if depth > 2 and total_steps >= depth:
        # Streaming reduce has little compute to hide DMA behind: a third
        # input buffer keeps the prefetch of tile i+1 fully hidden.
        in_spec_kwargs["pipeline_mode"] = pl.Buffered(depth)

    kernel = _make_kernel(fill, valid_last, mask_last)

    out = pl.pallas_call(
        kernel,
        out_shape=jax.ShapeDtypeStruct((n_split, B, kh), dtype),
        grid_spec=pltpu.PrefetchScalarGridSpec(
            num_scalar_prefetch=0,
            grid=(n_split, grid_b, grid_s),
            in_specs=[pl.BlockSpec(
                (tb, ts, kh),
                lambda p, b, s: (b, p * grid_s + s, 0),
                **in_spec_kwargs)],
            # Same out-block index for every s-step -> VMEM-resident
            # accumulator, written back to HBM only when (p, b) changes.
            out_specs=pl.BlockSpec((1, tb, kh), lambda p, b, s: (p, b, 0)),
        ),
        compiler_params=pltpu.CompilerParams(
            dimension_semantics=("parallel", "parallel", "arbitrary"),
            vmem_limit_bytes=_VMEM_LIMIT_BYTES,
        ),
    )(xf)

    out = out[0] if n_split == 1 else jnp.max(out, axis=0)
    if k > 1:
        # Tiny final reduce over the k folded lane groups: (B, k*H) -> (B, H).
        out = jnp.max(out.reshape(B, k, H), axis=1)
    return out


def lambda_layer(x, *, force_pallas=False):
    """LambdaLayer forward with lambd = global max over the sequence axis.

    x: (B, S, H) -> (B, H)   (matches torch.max(x, dim=1)[0] semantics)
    """
    if (not force_pallas
            and x.size * jnp.dtype(x.dtype).itemsize < _PALLAS_MIN_BYTES):
        # TODO(synk): at production scale, fuse this reduce into the producing
        # conv/matmul epilogue instead of launching a standalone kernel.
        return jnp.max(x, axis=1)
    return _lambda_maxpool_pallas(x)


if __name__ == "__main__":
    key = jax.random.PRNGKey(0)
    k0, k1, k2, k3 = jax.random.split(key, 4)

    tests = [
        (k0, (2, 8, 32), jnp.float32),      # l2x demo shape (forced Pallas)
        (k1, (2, 333, 32), jnp.float32),    # ragged S -> divisor fold, no pad
        (k2, (2, 2400, 64), jnp.float32),   # partial last tile -> in-kernel mask
        (k3, (8, 2048, 64), jnp.bfloat16),  # 2-way split path + packed dtype
    ]
    for kk, (b, s, h), dt in tests:
        x = jax.random.normal(kk, (b, s, h), dtype=dt)
        y = jax.block_until_ready(lambda_layer(x, force_pallas=True))
        y_ref = jnp.max(x, axis=1)
        assert y.shape == (b, h)
        assert jnp.array_equal(y, y_ref), f"Pallas mismatch for {(b, s, h, dt)}"

    print("KERNEL_OK")
</pallas_src>

<mosaic_0001>
module attributes {stable_mosaic.version = 11 : i64} {
  func.func @kernel(%arg0: i32, %arg1: i32, %arg2: i32, %arg3: memref<2x2x128xf32, #tpu.memory_space<vmem>>, %arg4: memref<1x2x128xf32, #tpu.memory_space<vmem>>) attributes {dimension_semantics = [#tpu.dimension_semantics<parallel>, #tpu.dimension_semantics<parallel>, #tpu.dimension_semantics<arbitrary>], iteration_bounds = array<i64: 1, 1, 1>, scalar_prefetch = 0 : i64, scratch_operands = 0 : i64, tpu.core_type = #tpu.core_type<tc>, window_params = [{transform_indices = @transform_0, window_bounds = array<i64: 2, 2, 128>}, {transform_indices = @transform_1, window_bounds = array<i64: 1, 2, 128>}]} {
    %c0_i32 = arith.constant 0 : i32
    %0 = arith.cmpi eq, %arg2, %c0_i32 : i32
    %1 = arith.extui %0 : i1 to i32
    %c0_i32_0 = arith.constant 0 : i32
    %2 = arith.cmpi ne, %1, %c0_i32_0 : i32
    scf.if %2 {
      %cst_9 = arith.constant 0xFF800000 : f32
      %9 = vector.broadcast %cst_9 : f32 to vector<1x2x128xf32>
      %c0_10 = arith.constant 0 : index
      %c0_11 = arith.constant 0 : index
      %c0_12 = arith.constant 0 : index
      %10 = vector.load %arg4[%c0_10, %c0_11, %c0_12] : memref<1x2x128xf32, #tpu.memory_space<vmem>>, vector<1x2x128xf32>
      tpu.vector_store %arg4[%c0_10, %c0_11, %c0_12], %9 {strides = array<i32>} : memref<1x2x128xf32, #tpu.memory_space<vmem>>, vector<1x2x128xf32>,
    } else {
    }
    %c0 = arith.constant 0 : index
    %c0_1 = arith.constant 0 : index
    %c0_2 = arith.constant 0 : index
    %3 = vector.load %arg4[%c0, %c0_1, %c0_2] : memref<1x2x128xf32, #tpu.memory_space<vmem>>, vector<1x2x128xf32>
    %c0_3 = arith.constant 0 : index
    %c0_4 = arith.constant 0 : index
    %c0_5 = arith.constant 0 : index
    %4 = vector.load %arg3[%c0_3, %c0_4, %c0_5] : memref<2x2x128xf32, #tpu.memory_space<vmem>>, vector<2x2x128xf32>
    %cst = arith.constant dense<0xFF800000> : vector<2x128xf32>
    %5 = vector.multi_reduction <maximumf>, %4, %cst [1] : vector<2x2x128xf32> to vector<2x128xf32>
    %6 = vector.shape_cast %5 : vector<2x128xf32> to vector<1x2x128xf32>
    %7 = arith.maximumf %3, %6 : vector<1x2x128xf32>
    %c0_6 = arith.constant 0 : index
    %c0_7 = arith.constant 0 : index
    %c0_8 = arith.constant 0 : index
    %8 = vector.load %arg4[%c0_6, %c0_7, %c0_8] : memref<1x2x128xf32, #tpu.memory_space<vmem>>, vector<1x2x128xf32>
    tpu.vector_store %arg4[%c0_6, %c0_7, %c0_8], %7 {strides = array<i32>} : memref<1x2x128xf32, #tpu.memory_space<vmem>>, vector<1x2x128xf32>,
    return
  }
  func.func @transform_0(%arg0: i32, %arg1: i32, %arg2: i32) -> (i32, i32, i32) {
    %c1_i32 = arith.constant 1 : i32
    %0 = arith.muli %arg0, %c1_i32 : i32
    %1 = arith.addi %0, %arg2 : i32
    %c0_i32 = arith.constant 0 : i32
    %c0_i32_0 = arith.constant 0 : i32
    return %arg1, %1, %c0_i32 : i32, i32, i32
  }
  func.func @transform_1(%arg0: i32, %arg1: i32, %arg2: i32) -> (i32, i32, i32) {
    %c0_i32 = arith.constant 0 : i32
    %c0_i32_0 = arith.constant 0 : i32
    return %arg0, %arg1, %c0_i32 : i32, i32, i32
  }
}

</mosaic_0001>

<bundles_post_ra>
// kernel: tpu_custom_call.1
= control target key start
LH: loop header
LB: loop body
LE: loop exit
PB: predicated region body
PF: predicated region fallthrough
CT: control target
= control target key end

     0   :  { %6 = vsyncpa [#allocation3], 0  ;;  %s164_s0 = inlined_call_operand.hbm [shape: f32[2,2,128], index: 0, kind: input, shape index: {}]   ;;  %s165_s1 = inlined_call_operand.hbm [shape: f32[1,2,128], index: 1, kind: output, shape index: {}]  }
   0x1   :  { %7 = vsyncpa [#allocation4], 0  ;;  %s125_s6 = smov [#allocation2]   ;;  %s77_s10 = scalar_lea.hbm %s164_s0, 64 }
   0x2   :  { %s16_s7 = sshll.u32 %s125_s6, 4  ;;  %p78_p0 = scmp.ne.s32.totalorder %s164_s0, %s77_s10  ;;  %s17_s7 = int_to_ptr.vmem [resolvable:$true] %s16_s7 }
   0x3   :  { %p81_p1 = scmp.lt.u32.totalorder %s77_s10, %s164_s0 }
   0x5   :  { %p83_p2 = pnand %p81_p1, %p78_p0 }
   0x7   :  { %86 = shalt.err (!%p83_p2)
}
   0x8   :  { %s87_s15 = scalar_lea.vmem %s17_s7, 64  ;;  %p92_p4 = scmp.lt.s32.totalorder %s17_s7, %s17_s7 }
   0x9   :  { %p88_p3 = scmp.ne.s32.totalorder %s17_s7, %s87_s15  ;;  %p93_p5 = scmp.lt.s32.totalorder %s87_s15, %s87_s15 }
   0xb   :  { %p94_p6 = por %p93_p5, %p92_p4 }
   0xd   :  { %p95_p7 = pnand %p94_p6, %p88_p3 }
   0xf   :  { %98 = shalt.err (!%p95_p7)
}
  0x10   :  { %s126_s16 = smov 32   ;;  %s127_s17 = smov 2  }
  0x11   :  { %22 = dma.hbm_to_vmem [thread:$0]  %s164_s0, 64, %s17_s7, [#allocation3], %s126_s16, %s126_s16, %s127_s17  }
  0x12   :  { %121 = dma.done.wait [#allocation3], 64  }
  0x13   :  { %122 = vsyncadd [#allocation3], 4294967232  ;;  %v128_v0 = vmov -inf   ;;  %vm35_vm0 = vcmask 1041408   ;;  %v33_v1 = vld [vmem:[#allocation2] sm:$0x3] }
  0x14   :  { %31 = vst [vmem:[#allocation5] sm:$0x3] %v128_v0  ;;  %v34_v2 = vld [vmem:[#allocation2 + $0x2] sm:$0x3]  ;;  %v36_v3 = vsel %vm35_vm0, %v33_v1, -inf  ;;  %vm52_vm1 = vcmask 1041409  }
  0x15   :  { %v43_v4 = vsel %vm35_vm0, %v34_v2, -inf  ;;  %v37_v5 = vrot.slane %v36_v3, 4  ;;  %s129_s0 = smov [#allocation5]  }
  0x16   :  { %v44_v6 = vrot.slane %v43_v4, 4  ;;  %s63_s20 = sshll.u32 %s129_s0, 4  ;;  %s64_s20 = int_to_ptr.vmem [resolvable:$true] %s63_s20 }
  0x17   :  { %v38_v7 = vmax.f32 %v36_v3, %v37_v5  ;;  %s99_s21 = scalar_lea.vmem %s64_s20, 32  ;;  %p104_p9 = scmp.lt.s32.totalorder %s64_s20, %s64_s20 }
  0x18   :  { %v45_v8 = vmax.f32 %v43_v4, %v44_v6  ;;  %p100_p8 = scmp.ne.s32.totalorder %s64_s20, %s99_s21  ;;  %p105_p10 = scmp.lt.s32.totalorder %s99_s21, %s99_s21 }
  0x19   :  { %v39_v9 = vrot.slane %v38_v7, 2 }
  0x1a   :  { %v46_v10 = vrot.slane %v45_v8, 2  ;;  %p106_p11 = por %p105_p10, %p104_p9 }
  0x1b   :  { %v40_v11 = vmax.f32 %v38_v7, %v39_v9  ;;  %v32_v15 = vld [vmem:[#allocation5] sm:$0x3] }
  0x1c   :  { %v47_v12 = vmax.f32 %v45_v8, %v46_v10  ;;  %p107_p12 = pnand %p106_p11, %p100_p8 }
  0x1d   :  { %v41_v13 = vrot.slane %v40_v11, 1 }
  0x1e   :  { %v48_v14 = vrot.slane %v47_v12, 1 }
  0x1f   :  { %v42_v16 = vmax.f32 %v40_v11, %v41_v13 }
  0x20   :  { %v49_v17 = vmax.f32 %v47_v12, %v48_v14 }
  0x22   :  { %v53_v18 = vsel %vm52_vm1, %v49_v17, %v42_v16 }
  0x23   :  { %v55_v19 = vmax.f32 %v32_v15, %v53_v18 }
  0x25   :  { %56 = vst [vmem:[#allocation5] sm:$0x3] %v55_v19 }
  0x26   :  { %110 = shalt.err (!%p107_p12)
}
  0x27   :  { %s111_s24 = scalar_lea.hbm %s165_s1, 32 }
  0x28   :  { %p112_p13 = scmp.ne.s32.totalorder %s165_s1, %s111_s24  ;;  %p115_p0 = scmp.lt.u32.totalorder %s111_s24, %s165_s1 }
  0x2a   :  { %p117_p1 = pnand %p115_p0, %p112_p13 }
  0x2c   :  { %120 = shalt.err (!%p117_p1)
}
  0x2d   :  { %66 = dma.vmem_to_hbm [thread:$0]  %s64_s20, 32, %s165_s1, [#allocation4]  }
  0x2e   :  { %123 = dma.done.wait [#allocation4], 32  }
  0x2f   :  { %124 = vsyncadd [#allocation4], 4294967264 }
  0x30   :  { %70 = vsyncpa [#allocation3], 1 }
  0x31   :  { %71 = vsyncpa [#allocation4], 1 }

</bundles_post_ra>
